<compile_context>
chip_gen: v5e
topology: v5e:2x2
jax: 0.10.0
libtpu: 0.0.40
codegen_flags: <defaults>
</compile_context>

<pallas_src>
import jax
import jax.numpy as jnp
from jax.experimental import pallas as pl
from jax.experimental.pallas import tpu as pltpu


def _mtl_head_kernel(x_ref, w_ref, b_ref, out_ref):
    # x_ref:   (TB, C, HW)   feature-map block, backbone's native dtype.
    # w_ref:   (C, OUT_PAD)  f32 fused [Wd | Wc | 0-pad] head weights (resident).
    # b_ref:   (1, OUT_PAD)  f32 fused [bd | bc | 0-pad] bias (resident).
    # out_ref: (TB, OUT_PAD) f32 fused logits.
    x = x_ref[...]
    tb, _, hw = x.shape

    # AdaptiveAvgPool2d((1,1)) + flatten as an MXU contraction over HW (the lane
    # axis): ones(TB,8,HW) . x(TB,C,HW)^T -> (TB,8,C) with f32 accumulation.
    # The 8 identical rows keep every dim sublane-aligned; the MXU pass count is
    # the same as one row and the redundancy is folded into the final scale.
    ones = jnp.ones((tb, 8, hw), dtype=x.dtype)
    sums = jnp.einsum("bqh,bch->bqc", ones, x,
                      preferred_element_type=jnp.float32)        # (TB, 8, C)
    feats = jnp.sum(sums, axis=1) * (1.0 / (8 * hw))             # (TB, C) spatial mean

    # Fused dual-head linear layer: one lane-dense (C, OUT_PAD) MXU matmul.
    w = w_ref[...].astype(jnp.float32)
    out = jnp.dot(feats, w, preferred_element_type=jnp.float32)  # (TB, OUT_PAD)
    out_ref[...] = out + b_ref[...]                              # bias broadcasts over batch


def prepare_head_params(wd, bd, wc, bc):
    """Build fused, lane-padded head parameters once at model init.

    wd: (num_domains, C), bd: (num_domains,)     -- nn.Linear (out, in) layout
    wc: (num_categories, C), bc: (num_categories,)
    Returns (w_fused (C, OUT_PAD) f32, b_fused (1, OUT_PAD) f32).
    """
    nd, _ = wd.shape
    nc = wc.shape[0]
    n_out = nd + nc
    out_pad = max(128, pl.cdiv(n_out, 128) * 128)
    w = jnp.concatenate([wd.T, wc.T], axis=1).astype(jnp.float32)   # (C, ND+NC)
    w = jnp.pad(w, ((0, 0), (0, out_pad - n_out)))
    b = jnp.concatenate([bd, bc]).astype(jnp.float32)
    b = jnp.pad(b, (0, out_pad - n_out)).reshape(1, out_pad)
    return w, b


def _pick_batch_tile(batch, c, hw, itemsize):
    # ~8 MiB of feature map per block (review: 4-8 MiB) so the HBM DMA dominates
    # the ~0.35us per-grid-step overhead, while double-buffered blocks stay far
    # below the smallest per-generation VMEM budget (v7x: 64 MiB physical).
    if batch <= 8:
        return batch
    target_bytes = 8 << 20
    tb = int(max(8, min(64, target_bytes // max(c * hw * itemsize, 1))))
    if batch >= 16:
        tb = min(tb, batch // 2)     # >=2 grid steps -> both TensorCores get work
    tb = max(8, (tb // 8) * 8)       # out block second-minor dim must be % 8 == 0
    return min(tb, batch)


def _vmem_limit_bytes(tb, c, hw, out_pad, x_itemsize):
    x_block = tb * c * hw * x_itemsize
    out_block = tb * out_pad * 4
    resident = (c + 1) * out_pad * 4
    scratch = tb * 9 * c * 4 + out_block          # in-kernel f32 intermediates
    need = 2 * (x_block + out_block + resident) + scratch
    return int(min(max(2 * need, 4 << 20), 64 << 20))


def multitask_head(feat_map, w_fused, b_fused, *, num_domains, num_categories,
                   tb=None, vmem_limit_bytes=None):
    """MultiTaskModel head: adaptive average pool + two fused linear classifiers.

    feat_map: (B, C, H, W) backbone feature map in its native NCHW layout and
              dtype (f32 or bf16) -- it is read from HBM exactly once, by the
              kernel (no wrapper transpose / cast).
    w_fused / b_fused: from prepare_head_params (built once at init).
    Returns (domain_preds (B, num_domains), category_preds (B, num_categories)).
    """
    batch, c, h, w = feat_map.shape
    hw = h * w
    out_pad = w_fused.shape[1]
    assert w_fused.shape == (c, out_pad) and b_fused.shape == (1, out_pad)
    assert num_domains + num_categories <= out_pad

    x = feat_map.reshape(batch, c, hw)        # free reshape, no relayout / no cast

    if tb is None:
        tb = _pick_batch_tile(batch, c, hw, x.dtype.itemsize)
    tb = min(tb, batch)
    if vmem_limit_bytes is None:
        vmem_limit_bytes = _vmem_limit_bytes(tb, c, hw, out_pad, x.dtype.itemsize)

    # If batch % tb != 0 the trailing block is partial; rows are independent, so
    # the padded (undefined) rows never affect in-range outputs and are not
    # written back.
    grid = (pl.cdiv(batch, tb),)

    fused = pl.pallas_call(
        _mtl_head_kernel,
        grid=grid,
        in_specs=[
            pl.BlockSpec((tb, c, hw), lambda i: (i, 0, 0)),     # batch-tiled features
            pl.BlockSpec((c, out_pad), lambda i: (0, 0)),       # resident fused weights
            pl.BlockSpec((1, out_pad), lambda i: (0, 0)),       # resident fused bias
        ],
        out_specs=pl.BlockSpec((tb, out_pad), lambda i: (i, 0)),
        out_shape=jax.ShapeDtypeStruct((batch, out_pad), jnp.float32),
        compiler_params=pltpu.CompilerParams(
            dimension_semantics=("parallel",),
            vmem_limit_bytes=vmem_limit_bytes),
    )(x, w_fused, b_fused)

    return (fused[:, :num_domains],
            fused[:, num_domains:num_domains + num_categories])


if __name__ == "__main__":
    # Small shapes consistent with the module's forward: the backbone's last
    # feature map (B, feature_dim, H, W) plus the two classifier heads.
    B, C, H, W = 16, 128, 8, 8                 # feature_dim stand-in (b1: 1280, 7x7)
    NUM_DOMAINS, NUM_CATEGORIES = 4, 65

    key = jax.random.PRNGKey(0)
    kx, kwd, kbd, kwc, kbc = jax.random.split(key, 5)
    feat_map = jax.random.normal(kx, (B, C, H, W), dtype=jnp.float32)
    # nn.Linear parameters in their PyTorch (out_features, in_features) layout.
    wd = 0.1 * jax.random.normal(kwd, (NUM_DOMAINS, C), dtype=jnp.float32)
    bd = 0.1 * jax.random.normal(kbd, (NUM_DOMAINS,), dtype=jnp.float32)
    wc = 0.1 * jax.random.normal(kwc, (NUM_CATEGORIES, C), dtype=jnp.float32)
    bc = 0.1 * jax.random.normal(kbc, (NUM_CATEGORIES,), dtype=jnp.float32)

    # Fused head parameters are built once at "model init", not per forward call.
    w_fused, b_fused = prepare_head_params(wd, bd, wc, bc)

    dom, cat = multitask_head(feat_map, w_fused, b_fused,
                              num_domains=NUM_DOMAINS, num_categories=NUM_CATEGORIES)
    jax.block_until_ready((dom, cat))

    # Pure-JAX f32 reference of the PyTorch forward (pool -> flatten -> heads).
    feats = jnp.mean(feat_map, axis=(2, 3))
    ref_dom = feats @ wd.T + bd
    ref_cat = feats @ wc.T + bc

    assert dom.shape == (B, NUM_DOMAINS) and cat.shape == (B, NUM_CATEGORIES)
    assert jnp.allclose(dom, ref_dom, rtol=2e-2, atol=2e-2), \
        float(jnp.max(jnp.abs(dom - ref_dom)))
    assert jnp.allclose(cat, ref_cat, rtol=2e-2, atol=2e-2), \
        float(jnp.max(jnp.abs(cat - ref_cat)))

    # Ragged batch: a trailing partial block (B=12 with tb=8) must not perturb
    # in-range rows (rows are independent; OOB rows are never written back).
    dom12, cat12 = multitask_head(feat_map[:12], w_fused, b_fused,
                                  num_domains=NUM_DOMAINS,
                                  num_categories=NUM_CATEGORIES, tb=8)
    jax.block_until_ready((dom12, cat12))
    assert jnp.allclose(dom12, ref_dom[:12], rtol=2e-2, atol=2e-2)
    assert jnp.allclose(cat12, ref_cat[:12], rtol=2e-2, atol=2e-2)

    print("KERNEL_OK")
</pallas_src>

<mosaic_0001>
module attributes {stable_mosaic.version = 11 : i64} {
  func.func @_mtl_head_kernel(%arg0: i32, %arg1: memref<8x128x64xf32, #tpu.memory_space<vmem>>, %arg2: memref<128x128xf32, #tpu.memory_space<vmem>>, %arg3: memref<1x128xf32, #tpu.memory_space<vmem>>, %arg4: memref<8x128xf32, #tpu.memory_space<vmem>>) attributes {dimension_semantics = [#tpu.dimension_semantics<parallel>], iteration_bounds = array<i64: 2>, scalar_prefetch = 0 : i64, scratch_operands = 0 : i64, tpu.core_type = #tpu.core_type<tc>, window_params = [{transform_indices = @transform_0, window_bounds = array<i64: 8, 128, 64>}, {pipeline_mode = #tpu.pipeline_mode<synchronous>, transform_indices = @transform_1, window_bounds = array<i64: 128, 128>}, {pipeline_mode = #tpu.pipeline_mode<synchronous>, transform_indices = @transform_2, window_bounds = array<i64: 1, 128>}, {transform_indices = @transform_3, window_bounds = array<i64: 8, 128>}]} {
    %c0 = arith.constant 0 : index
    %c0_0 = arith.constant 0 : index
    %c0_1 = arith.constant 0 : index
    %0 = vector.load %arg1[%c0, %c0_0, %c0_1] : memref<8x128x64xf32, #tpu.memory_space<vmem>>, vector<8x128x64xf32>
    %cst = arith.constant 1.000000e+00 : f32
    %1 = vector.broadcast %cst : f32 to vector<8x8x64xf32>
    "tpu.trace_start"() <{level = 10 : i32, message = "bqh,bch->bqc"}> : () -> ()
    %cst_2 = arith.constant dense<0.000000e+00> : vector<8x8x128xf32>
    %2 = tpu.matmul %1, %0, %cst_2 {dimension_numbers = #tpu.dot_dimension_numbers<[2], [2], [1], [1], [0, 0, 0, 1, 1, 1], [0], [0]>} : vector<8x8x64xf32>, vector<8x128x64xf32>, vector<8x8x128xf32> -> vector<8x8x128xf32>
    "tpu.trace_stop"() : () -> ()
    %cst_3 = arith.constant dense<0.000000e+00> : vector<8x128xf32>
    %3 = vector.multi_reduction <add>, %2, %cst_3 [1] : vector<8x8x128xf32> to vector<8x128xf32>
    %cst_4 = arith.constant 0.001953125 : f32
    %4 = vector.broadcast %cst_4 : f32 to vector<8x128xf32>
    %5 = arith.mulf %3, %4 : vector<8x128xf32>
    %c0_5 = arith.constant 0 : index
    %c0_6 = arith.constant 0 : index
    %6 = vector.load %arg2[%c0_5, %c0_6] : memref<128x128xf32, #tpu.memory_space<vmem>>, vector<128x128xf32>
    %cst_7 = arith.constant dense<0.000000e+00> : vector<8x128xf32>
    %7 = tpu.matmul %5, %6, %cst_7 {dimension_numbers = #tpu.dot_dimension_numbers<[1], [0], [0], [1], [0, 0, 1, 1], [], []>} : vector<8x128xf32>, vector<128x128xf32>, vector<8x128xf32> -> vector<8x128xf32>
    %c0_8 = arith.constant 0 : index
    %c0_9 = arith.constant 0 : index
    %8 = vector.load %arg3[%c0_8, %c0_9] : memref<1x128xf32, #tpu.memory_space<vmem>>, vector<1x128xf32>
    %9 = vector.broadcast %8 : vector<1x128xf32> to vector<8x128xf32>
    %10 = arith.addf %7, %9 : vector<8x128xf32>
    %c0_10 = arith.constant 0 : index
    %c0_11 = arith.constant 0 : index
    %11 = vector.load %arg4[%c0_10, %c0_11] : memref<8x128xf32, #tpu.memory_space<vmem>>, vector<8x128xf32>
    tpu.vector_store %arg4[%c0_10, %c0_11], %10 {strides = array<i32>} : memref<8x128xf32, #tpu.memory_space<vmem>>, vector<8x128xf32>,
    return
  }
  func.func @transform_0(%arg0: i32) -> (i32, i32, i32) {
    %c0_i32 = arith.constant 0 : i32
    %c0_i32_0 = arith.constant 0 : i32
    %c0_i32_1 = arith.constant 0 : i32
    return %arg0, %c0_i32, %c0_i32_0 : i32, i32, i32
  }
  func.func @transform_1(%arg0: i32) -> (i32, i32) {
    %c0_i32 = arith.constant 0 : i32
    %c0_i32_0 = arith.constant 0 : i32
    %c0_i32_1 = arith.constant 0 : i32
    return %c0_i32, %c0_i32_0 : i32, i32
  }
  func.func @transform_2(%arg0: i32) -> (i32, i32) {
    %c0_i32 = arith.constant 0 : i32
    %c0_i32_0 = arith.constant 0 : i32
    %c0_i32_1 = arith.constant 0 : i32
    return %c0_i32, %c0_i32_0 : i32, i32
  }
  func.func @transform_3(%arg0: i32) -> (i32, i32) {
    %c0_i32 = arith.constant 0 : i32
    %c0_i32_0 = arith.constant 0 : i32
    return %arg0, %c0_i32 : i32, i32
  }
}

</mosaic_0001>

<bundles_post_ra>
// kernel: tpu_custom_call.1
= control target key start
LH: loop header
LB: loop body
LE: loop exit
PB: predicated region body
PF: predicated region fallthrough
CT: control target
= control target key end

     0   :  { %8 = vsyncpa [#allocation3], 0  ;;  %s1729_s0 = inlined_call_operand.vmem [shape: f32[16,128,64], index: 0, kind: input, shape index: {}]   ;;  %s1730_s1 = inlined_call_operand.vmem [shape: f32[128,128], index: 1, kind: input, shape index: {}]   ;;  %s1731_s2 = inlined_call_operand.vmem [shape: f32[1,128], index: 2, kind: input, shape index: {}]   ;;  %s1732_s3 = inlined_call_operand.hbm [shape: f32[16,128], index: 3, kind: output, shape index: {}]  }
   0x1   :  { %10 = vsyncpa [#allocation3 + $0x1], 0  ;;  %s1320_s12 = smov 0   ;;  %s1322_s13 = smov 0  }
   0x2   :  { %s1324_s14 = smov 0   ;;  %s1326_s15 = smov 0  }
   0x3 LB: > { %s1044_s16 = sadd.s32 4294967295, %s1297_s15   ;;  %s1045_s17 = sadd.s32 4294967294, %s1297_s15   ;;  %s1297_s15 = sphi %s1326_s15, %s1738_s15   ;;  %s1293_s14 = sphi %s1324_s14, %s1737_s14   ;;  %s1289_s13 = sphi %s1322_s13, %s1736_s13   ;;  %s1285_s12 = sphi %s1320_s12, %s1735_s12  }
   0x4   : > { %s1343_s18 = sadd.s32 1, %s1297_s15   ;;  %s91_s19 = sadd.s32 1, %s1293_s14 }
   0x5   : > { %s88_s20 = ssub.s32 %s1297_s15, %s1343_s18  ;;  %p101_p0 = scmp.ne.s32.totalorder %s1293_s14, %s1289_s13 }
   0x6   : > { %p89_p1 = scmp.eq.s32.totalorder %s88_s20, 0  ;;  %p102_p2 = scmp.eq.s32.totalorder %s1044_s16, 1 }
   0x7   : > { %p107_p3 = scmp.ne.s32.totalorder %s1289_s13, %s1285_s12  ;;  %p108_p4 = scmp.eq.s32.totalorder %s1045_s17, 1 }
   0x8   : > { %s1353_s21 = scalar_select %p89_p1, %s1293_s14, %s91_s19  }
   0x9   : > { %p1355_p5 = por %p102_p2, %p101_p0  ;;  %p1359_p6 = por %p108_p4, %p107_p3 }
   0xa   : > { %p1048_p7 = scmp.ge.s32.totalorder %s1297_s15, 1  ;;  %p142_p8 = scmp.lt.s32.totalorder %s1297_s15, 3 }
   0xc   : > { %p143_p9 = pnand %p1048_p7, %p142_p8 }
   0xd   : > { %s1365_s24 = sshll.u32 (!%p143_p9), %s1044_s16, 3  ;;  %s1255_s17 = scalar_lea.hbm (!%p143_p9), %s1732_s3, 16 }
   0xe   : > { %146 = sbr.rel (%p143_p9) target bundleno = 432 (0x1b0), region = 32  ;;  %p168_p10 = scmp.lt.s32.totalorder (!%p143_p9), %s1365_s24, 15 }
   0xf   : > { %s981_s30 = scalar_lea.hbm (!%p143_p9), %s1732_s3, %s1365_s24 }
  0x10   : > { %s985_s8 = sshll.u32 (!%p143_p9), %s981_s30, 4  ;;  %s986_s8 = int_to_ptr.hbm [resolvable:$true] %s985_s8 }
  0x11   : > { %s1249_s10 = sshra.s32 (!%p143_p9), %s986_s8, 4  ;;  %s1250_s10 = int_to_ptr.hbm [resolvable:$true] %s1249_s10 }
  0x12   : > { %s1251_s11 = scalar_lea.hbm (!%p143_p9), %s1250_s10, 8  ;;  %p1256_p0 = scmp.lt.s32.totalorder (!%p143_p9), %s1250_s10, %s1732_s3 }
  0x13   : > { %s169_s25 = scalar_select %p168_p10, %s1365_s24, 15  ;;  %vm302_vm0 = vcmask 523264   ;;  %vm934_vm1 = vcmask 1041409   ;;  %vm936_vm2 = vcmask 1042434   ;;  %vm938_vm3 = vcmask 1043459  }
  0x14   : > { %vm940_vm4 = vcmask 1044484   ;;  %vm942_vm5 = vcmask 1045509   ;;  %vm944_vm6 = vcmask 1046534   ;;  %vm946_vm7 = vcmask 1047559   ;;  %p1252_p11 = scmp.ne.s32.totalorder %s1250_s10, %s1251_s11  ;;  %p1257_p1 = scmp.lt.s32.totalorder %s1255_s17, %s1251_s11 }
  0x15   : > { %s1193_s26 = sshll.u32 %s169_s25, 7 }
  0x16   : > { %s1372_s29 = scalar_lea.vmem %s1729_s0, %s1193_s26  ;;  %s164_s26 = sand.u32 1, %s1289_s13  }
  0x17   : > { %v189_v0 = vld [vmem:[%s1372_s29 + $0x78] sm:$0xff]  ;;  %v188_v4 = vld [vmem:[%s1372_s29 + $0x70] sm:$0xff]  ;;  %v187_v8 = vld [vmem:[%s1372_s29 + $0x68] sm:$0xff]  ;;  %s1049_s27 = sshll.u32 %s164_s26, 3  ;;  %s971_s9 = scalar_lea.sflag [#allocation3], %s164_s26 }
  0x18   : > { %v205_v1 = vld [vmem:[%s1372_s29 + $0xf8] sm:$0xff]  ;;  %1053 = vmatpush.xpose.msk.msra.mxu0 %vm302_vm0, %v189_v0  ;;  %v204_v5 = vld [vmem:[%s1372_s29 + $0xf0] sm:$0xff]  ;;  %v203_v9 = vld [vmem:[%s1372_s29 + $0xe8] sm:$0xff]  ;;  %s166_s6 = scalar_lea.vmem [#allocation2], %s1049_s27  ;;  %p1253_p12 = pnand %p1252_p11, %p1355_p5 }
  0x19   : > { %v221_v2 = vld [vmem:[%s1372_s29 + $0x178] sm:$0xff]  ;;  %1070 = vmatpush.xpose.msk.msra.mxu1 %vm302_vm0, %v205_v1  ;;  %v220_v6 = vld [vmem:[%s1372_s29 + $0x170] sm:$0xff]  ;;  %v219_v10 = vld [vmem:[%s1372_s29 + $0x168] sm:$0xff]  ;;  %s983_s7 = sshll.u32 %s166_s6, 4  ;;  %p1258_p2 = por %p1257_p1, %p1256_p0  ;;  %s984_s7 = int_to_ptr.vmem [resolvable:$true] %s983_s7 }
  0x1a   : > { %v237_v3 = vld [vmem:[%s1372_s29 + $0x1f8] sm:$0xff]  ;;  %1087 = vmatpush.xpose.msk.msra.mxu2 %vm302_vm0, %v221_v2  ;;  %v236_v7 = vld [vmem:[%s1372_s29 + $0x1f0] sm:$0xff]  ;;  %v235_v11 = vld [vmem:[%s1372_s29 + $0x1e8] sm:$0xff]  ;;  %p1254_p13 = pneg %p1253_p12 }
  0x1b   : > { %1104 = vmatpush.xpose.msk.msra.mxu3 %vm302_vm0, %v237_v3  ;;  %v186_v12 = vld [vmem:[%s1372_s29 + $0x60] sm:$0xff]  ;;  %v185_v16 = vld [vmem:[%s1372_s29 + $0x58] sm:$0xff]  ;;  %v184_v20 = vld [vmem:[%s1372_s29 + $0x50] sm:$0xff] }
  0x1c   : > { %1054 = vmatpush.xpose.msk.msra.mxu0 %vm302_vm0, %v188_v4  ;;  %v202_v13 = vld [vmem:[%s1372_s29 + $0xe0] sm:$0xff]  ;;  %v201_v17 = vld [vmem:[%s1372_s29 + $0xd8] sm:$0xff]  ;;  %v200_v21 = vld [vmem:[%s1372_s29 + $0xd0] sm:$0xff]  ;;  %p1259_p3 = pnand %p1258_p2, %p1254_p13 }
  0x1d   : > { %1071 = vmatpush.xpose.msk.msra.mxu1 %vm302_vm0, %v204_v5  ;;  %v218_v14 = vld [vmem:[%s1372_s29 + $0x160] sm:$0xff]  ;;  %v217_v18 = vld [vmem:[%s1372_s29 + $0x158] sm:$0xff]  ;;  %v216_v22 = vld [vmem:[%s1372_s29 + $0x150] sm:$0xff] }
  0x1e   : > { %1088 = vmatpush.xpose.msk.msra.mxu2 %vm302_vm0, %v220_v6  ;;  %v234_v15 = vld [vmem:[%s1372_s29 + $0x1e0] sm:$0xff]  ;;  %v233_v19 = vld [vmem:[%s1372_s29 + $0x1d8] sm:$0xff]  ;;  %v232_v23 = vld [vmem:[%s1372_s29 + $0x1d0] sm:$0xff] }
  0x1f   : > { %1105 = vmatpush.xpose.msk.msra.mxu3 %vm302_vm0, %v236_v7  ;;  %v183_v24 = vld [vmem:[%s1372_s29 + $0x48] sm:$0xff]  ;;  %v182_v28 = vld [vmem:[%s1372_s29 + $0x40] sm:$0xff]  ;;  %v181_v32 = vld [vmem:[%s1372_s29 + $0x38] sm:$0xff] }
  0x20   : > { %1055 = vmatpush.xpose.msk.msra.mxu0 %vm302_vm0, %v187_v8  ;;  %v199_v25 = vld [vmem:[%s1372_s29 + $0xc8] sm:$0xff]  ;;  %v198_v29 = vld [vmem:[%s1372_s29 + $0xc0] sm:$0xff]  ;;  %v197_v33 = vld [vmem:[%s1372_s29 + $0xb8] sm:$0xff] }
  0x21   : > { %1072 = vmatpush.xpose.msk.msra.mxu1 %vm302_vm0, %v203_v9  ;;  %v215_v26 = vld [vmem:[%s1372_s29 + $0x148] sm:$0xff]  ;;  %v214_v30 = vld [vmem:[%s1372_s29 + $0x140] sm:$0xff]  ;;  %v213_v34 = vld [vmem:[%s1372_s29 + $0x138] sm:$0xff] }
  0x22   : > { %1089 = vmatpush.xpose.msk.msra.mxu2 %vm302_vm0, %v219_v10  ;;  %v231_v27 = vld [vmem:[%s1372_s29 + $0x1c8] sm:$0xff]  ;;  %v230_v31 = vld [vmem:[%s1372_s29 + $0x1c0] sm:$0xff]  ;;  %v229_v35 = vld [vmem:[%s1372_s29 + $0x1b8] sm:$0xff] }
  0x23   : > { %1106 = vmatpush.xpose.msk.msra.mxu3 %vm302_vm0, %v235_v11  ;;  %v180_v36 = vld [vmem:[%s1372_s29 + $0x30] sm:$0xff]  ;;  %v179_v40 = vld [vmem:[%s1372_s29 + $0x28] sm:$0xff]  ;;  %v178_v44 = vld [vmem:[%s1372_s29 + $0x20] sm:$0xff] }
  0x24   : > { %1056 = vmatpush.xpose.msk.msra.mxu0 %vm302_vm0, %v186_v12  ;;  %v196_v37 = vld [vmem:[%s1372_s29 + $0xb0] sm:$0xff]  ;;  %v195_v41 = vld [vmem:[%s1372_s29 + $0xa8] sm:$0xff]  ;;  %v194_v45 = vld [vmem:[%s1372_s29 + $0xa0] sm:$0xff] }
  0x25   : > { %1073 = vmatpush.xpose.msk.msra.mxu1 %vm302_vm0, %v202_v13  ;;  %v212_v38 = vld [vmem:[%s1372_s29 + $0x130] sm:$0xff]  ;;  %v211_v42 = vld [vmem:[%s1372_s29 + $0x128] sm:$0xff]  ;;  %v210_v46 = vld [vmem:[%s1372_s29 + $0x120] sm:$0xff] }
  0x26   : > { %1090 = vmatpush.xpose.msk.msra.mxu2 %vm302_vm0, %v218_v14  ;;  %v228_v39 = vld [vmem:[%s1372_s29 + $0x1b0] sm:$0xff]  ;;  %v227_v43 = vld [vmem:[%s1372_s29 + $0x1a8] sm:$0xff]  ;;  %v226_v47 = vld [vmem:[%s1372_s29 + $0x1a0] sm:$0xff] }
  0x27   : > { %1107 = vmatpush.xpose.msk.msra.mxu3 %vm302_vm0, %v234_v15  ;;  %v177_v48 = vld [vmem:[%s1372_s29 + $0x18] sm:$0xff]  ;;  %v176_v52 = vld [vmem:[%s1372_s29 + $0x10] sm:$0xff]  ;;  %v175_v56 = vld [vmem:[%s1372_s29 + $0x8] sm:$0xff] }
  0x28   : > { %1057 = vmatpush.xpose.msk.msra.mxu0 %vm302_vm0, %v185_v16  ;;  %v193_v49 = vld [vmem:[%s1372_s29 + $0x98] sm:$0xff]  ;;  %v192_v53 = vld [vmem:[%s1372_s29 + $0x90] sm:$0xff]  ;;  %v191_v57 = vld [vmem:[%s1372_s29 + $0x88] sm:$0xff] }
  0x29   : > { %1074 = vmatpush.xpose.msk.msra.mxu1 %vm302_vm0, %v201_v17  ;;  %v209_v50 = vld [vmem:[%s1372_s29 + $0x118] sm:$0xff]  ;;  %v208_v54 = vld [vmem:[%s1372_s29 + $0x110] sm:$0xff]  ;;  %v207_v58 = vld [vmem:[%s1372_s29 + $0x108] sm:$0xff] }
  0x2a   : > { %1091 = vmatpush.xpose.msk.msra.mxu2 %vm302_vm0, %v217_v18  ;;  %v225_v51 = vld [vmem:[%s1372_s29 + $0x198] sm:$0xff]  ;;  %v224_v55 = vld [vmem:[%s1372_s29 + $0x190] sm:$0xff]  ;;  %v223_v59 = vld [vmem:[%s1372_s29 + $0x188] sm:$0xff] }
  0x2b   : > { %1108 = vmatpush.xpose.msk.msra.mxu3 %vm302_vm0, %v233_v19  ;;  %v174_v60 = vld [vmem:[%s1372_s29] sm:$0xff]  ;;  %v253_v0 = vld [vmem:[%s1372_s29 + $0x278] sm:$0xff]  ;;  %v252_v4 = vld [vmem:[%s1372_s29 + $0x270] sm:$0xff] }
  0x2c   : > { %1058 = vmatpush.xpose.msk.msra.mxu0 %vm302_vm0, %v184_v20  ;;  %v190_v61 = vld [vmem:[%s1372_s29 + $0x80] sm:$0xff]  ;;  %v269_v1 = vld [vmem:[%s1372_s29 + $0x2f8] sm:$0xff]  ;;  %v268_v5 = vld [vmem:[%s1372_s29 + $0x2f0] sm:$0xff]  ;;  %v1299_v20 = vmov 1.0  }
  0x2d   : > { %1075 = vmatpush.xpose.msk.msra.mxu1 %vm302_vm0, %v200_v21  ;;  %v206_v62 = vld [vmem:[%s1372_s29 + $0x100] sm:$0xff]  ;;  %v285_v2 = vld [vmem:[%s1372_s29 + $0x378] sm:$0xff]  ;;  %v284_v6 = vld [vmem:[%s1372_s29 + $0x370] sm:$0xff] }
  0x2e   : > { %1092 = vmatpush.xpose.msk.msra.mxu2 %vm302_vm0, %v216_v22  ;;  %v222_v63 = vld [vmem:[%s1372_s29 + $0x180] sm:$0xff]  ;;  %v301_v3 = vld [vmem:[%s1372_s29 + $0x3f8] sm:$0xff]  ;;  %v300_v7 = vld [vmem:[%s1372_s29 + $0x3f0] sm:$0xff] }
  0x2f   : > { %1109 = vmatpush.xpose.msk.msra.mxu3 %vm302_vm0, %v232_v23  ;;  %v251_v8 = vld [vmem:[%s1372_s29 + $0x268] sm:$0xff]  ;;  %v250_v12 = vld [vmem:[%s1372_s29 + $0x260] sm:$0xff]  ;;  %v249_v16 = vld [vmem:[%s1372_s29 + $0x258] sm:$0xff] }
  0x30   : > { %1059 = vmatpush.xpose.msk.msra.mxu0 %vm302_vm0, %v183_v24  ;;  %v267_v9 = vld [vmem:[%s1372_s29 + $0x2e8] sm:$0xff]  ;;  %v266_v13 = vld [vmem:[%s1372_s29 + $0x2e0] sm:$0xff]  ;;  %v265_v17 = vld [vmem:[%s1372_s29 + $0x2d8] sm:$0xff] }
  0x31   : > { %1076 = vmatpush.xpose.msk.msra.mxu1 %vm302_vm0, %v199_v25  ;;  %v283_v10 = vld [vmem:[%s1372_s29 + $0x368] sm:$0xff]  ;;  %v282_v14 = vld [vmem:[%s1372_s29 + $0x360] sm:$0xff]  ;;  %v281_v18 = vld [vmem:[%s1372_s29 + $0x358] sm:$0xff] }
  0x32   : > { %1093 = vmatpush.xpose.msk.msra.mxu2 %vm302_vm0, %v215_v26  ;;  %v299_v11 = vld [vmem:[%s1372_s29 + $0x3e8] sm:$0xff]  ;;  %v298_v15 = vld [vmem:[%s1372_s29 + $0x3e0] sm:$0xff]  ;;  %v297_v19 = vld [vmem:[%s1372_s29 + $0x3d8] sm:$0xff] }
  0x33   : > { %1110 = vmatpush.xpose.msk.msra.mxu3 %vm302_vm0, %v231_v27  ;;  %v248_v21 = vld [vmem:[%s1372_s29 + $0x250] sm:$0xff]  ;;  %v247_v25 = vld [vmem:[%s1372_s29 + $0x248] sm:$0xff] }
  0x34   : > { %1060 = vmatpush.xpose.msk.msra.mxu0 %vm302_vm0, %v182_v28  ;;  %v264_v22 = vld [vmem:[%s1372_s29 + $0x2d0] sm:$0xff]  ;;  %v263_v26 = vld [vmem:[%s1372_s29 + $0x2c8] sm:$0xff] }
  0x35   : > { %1077 = vmatpush.xpose.msk.msra.mxu1 %vm302_vm0, %v198_v29  ;;  %v280_v23 = vld [vmem:[%s1372_s29 + $0x350] sm:$0xff]  ;;  %v279_v27 = vld [vmem:[%s1372_s29 + $0x348] sm:$0xff]  ;;  %v246_v29 = vld [vmem:[%s1372_s29 + $0x240] sm:$0xff] }
  0x36   : > { %1094 = vmatpush.xpose.msk.msra.mxu2 %vm302_vm0, %v214_v30  ;;  %v296_v24 = vld [vmem:[%s1372_s29 + $0x3d0] sm:$0xff]  ;;  %v295_v28 = vld [vmem:[%s1372_s29 + $0x3c8] sm:$0xff]  ;;  %v262_v30 = vld [vmem:[%s1372_s29 + $0x2c0] sm:$0xff] }
  0x37   : > { %1111 = vmatpush.xpose.msk.msra.mxu3 %vm302_vm0, %v230_v31  ;;  %v278_v31 = vld [vmem:[%s1372_s29 + $0x340] sm:$0xff] }
  0x38   : > { %1061 = vmatpush.xpose.msk.msra.mxu0 %vm302_vm0, %v181_v32  ;;  %v294_v32 = vld [vmem:[%s1372_s29 + $0x3c0] sm:$0xff] }
  0x39   : > { %1078 = vmatpush.xpose.msk.msra.mxu1 %vm302_vm0, %v197_v33  ;;  %v245_v33 = vld [vmem:[%s1372_s29 + $0x238] sm:$0xff] }
  0x3a   : > { %1095 = vmatpush.xpose.msk.msra.mxu2 %vm302_vm0, %v213_v34  ;;  %v261_v34 = vld [vmem:[%s1372_s29 + $0x2b8] sm:$0xff] }
  0x3b   : > { %1112 = vmatpush.xpose.msk.msra.mxu3 %vm302_vm0, %v229_v35  ;;  %v277_v35 = vld [vmem:[%s1372_s29 + $0x338] sm:$0xff] }
  0x3c   : > { %1062 = vmatpush.xpose.msk.msra.mxu0 %vm302_vm0, %v180_v36  ;;  %v293_v36 = vld [vmem:[%s1372_s29 + $0x3b8] sm:$0xff] }
  0x3d   : > { %1079 = vmatpush.xpose.msk.msra.mxu1 %vm302_vm0, %v196_v37  ;;  %v244_v37 = vld [vmem:[%s1372_s29 + $0x230] sm:$0xff] }
  0x3e   : > { %1096 = vmatpush.xpose.msk.msra.mxu2 %vm302_vm0, %v212_v38  ;;  %v260_v38 = vld [vmem:[%s1372_s29 + $0x2b0] sm:$0xff] }
  0x3f   : > { %1113 = vmatpush.xpose.msk.msra.mxu3 %vm302_vm0, %v228_v39  ;;  %v276_v39 = vld [vmem:[%s1372_s29 + $0x330] sm:$0xff] }
  0x40   : > { %1063 = vmatpush.xpose.msk.msra.mxu0 %vm302_vm0, %v179_v40  ;;  %v292_v40 = vld [vmem:[%s1372_s29 + $0x3b0] sm:$0xff] }
  0x41   : > { %1080 = vmatpush.xpose.msk.msra.mxu1 %vm302_vm0, %v195_v41  ;;  %v243_v41 = vld [vmem:[%s1372_s29 + $0x228] sm:$0xff] }
  0x42   : > { %1097 = vmatpush.xpose.msk.msra.mxu2 %vm302_vm0, %v211_v42  ;;  %v259_v42 = vld [vmem:[%s1372_s29 + $0x2a8] sm:$0xff] }
  0x43   : > { %1114 = vmatpush.xpose.msk.msra.mxu3 %vm302_vm0, %v227_v43  ;;  %v275_v43 = vld [vmem:[%s1372_s29 + $0x328] sm:$0xff] }
  0x44   : > { %1064 = vmatpush.xpose.msk.msra.mxu0 %vm302_vm0, %v178_v44  ;;  %v291_v44 = vld [vmem:[%s1372_s29 + $0x3a8] sm:$0xff] }
  0x45   : > { %1081 = vmatpush.xpose.msk.msra.mxu1 %vm302_vm0, %v194_v45  ;;  %v242_v45 = vld [vmem:[%s1372_s29 + $0x220] sm:$0xff] }
  0x46   : > { %1098 = vmatpush.xpose.msk.msra.mxu2 %vm302_vm0, %v210_v46  ;;  %v258_v46 = vld [vmem:[%s1372_s29 + $0x2a0] sm:$0xff] }
  0x47   : > { %1115 = vmatpush.xpose.msk.msra.mxu3 %vm302_vm0, %v226_v47  ;;  %v274_v47 = vld [vmem:[%s1372_s29 + $0x320] sm:$0xff] }
  0x48   : > { %1065 = vmatpush.xpose.msk.msra.mxu0 %vm302_vm0, %v177_v48  ;;  %v290_v48 = vld [vmem:[%s1372_s29 + $0x3a0] sm:$0xff] }
  0x49   : > { %1082 = vmatpush.xpose.msk.msra.mxu1 %vm302_vm0, %v193_v49  ;;  %v241_v49 = vld [vmem:[%s1372_s29 + $0x218] sm:$0xff] }
  0x4a   : > { %1099 = vmatpush.xpose.msk.msra.mxu2 %vm302_vm0, %v209_v50  ;;  %v257_v50 = vld [vmem:[%s1372_s29 + $0x298] sm:$0xff] }
  0x4b   : > { %1116 = vmatpush.xpose.msk.msra.mxu3 %vm302_vm0, %v225_v51  ;;  %v273_v51 = vld [vmem:[%s1372_s29 + $0x318] sm:$0xff] }
  0x4c   : > { %1066 = vmatpush.xpose.msk.msra.mxu0 %vm302_vm0, %v176_v52  ;;  %v289_v52 = vld [vmem:[%s1372_s29 + $0x398] sm:$0xff] }
  0x4d   : > { %1083 = vmatpush.xpose.msk.msra.mxu1 %vm302_vm0, %v192_v53  ;;  %v240_v53 = vld [vmem:[%s1372_s29 + $0x210] sm:$0xff] }
  0x4e   : > { %1100 = vmatpush.xpose.msk.msra.mxu2 %vm302_vm0, %v208_v54  ;;  %v256_v54 = vld [vmem:[%s1372_s29 + $0x290] sm:$0xff] }
  0x4f   : > { %1117 = vmatpush.xpose.msk.msra.mxu3 %vm302_vm0, %v224_v55  ;;  %v272_v55 = vld [vmem:[%s1372_s29 + $0x310] sm:$0xff] }
  0x50   : > { %1067 = vmatpush.xpose.msk.msra.mxu0 %vm302_vm0, %v175_v56  ;;  %v288_v56 = vld [vmem:[%s1372_s29 + $0x390] sm:$0xff] }
  0x51   : > { %1084 = vmatpush.xpose.msk.msra.mxu1 %vm302_vm0, %v191_v57  ;;  %v239_v57 = vld [vmem:[%s1372_s29 + $0x208] sm:$0xff] }
  0x52   : > { %1101 = vmatpush.xpose.msk.msra.mxu2 %vm302_vm0, %v207_v58  ;;  %v255_v58 = vld [vmem:[%s1372_s29 + $0x288] sm:$0xff] }
  0x53   : > { %1118 = vmatpush.xpose.msk.msra.mxu3 %vm302_vm0, %v223_v59  ;;  %v271_v59 = vld [vmem:[%s1372_s29 + $0x308] sm:$0xff] }
  0x54   : > { %1068 = vmatpush.xpose.msk.msra.mxu0 %vm302_vm0, %v174_v60  ;;  %v287_v60 = vld [vmem:[%s1372_s29 + $0x388] sm:$0xff] }
  0x55   : > { %1085 = vmatpush.xpose.msk.msra.mxu1 %vm302_vm0, %v190_v61  ;;  %v238_v61 = vld [vmem:[%s1372_s29 + $0x200] sm:$0xff] }
  0x56   : > { %1102 = vmatpush.xpose.msk.msra.mxu2 %vm302_vm0, %v206_v62  ;;  %v254_v62 = vld [vmem:[%s1372_s29 + $0x280] sm:$0xff] }
  0x57   : > { %1119 = vmatpush.xpose.msk.msra.mxu3 %vm302_vm0, %v222_v63  ;;  %1069 = vmatmul.msk.f32.vlgmr.msra.gmra.mxu0 %vm302_vm0, %v1299_v20  ;;  %v270_v63 = vld [vmem:[%s1372_s29 + $0x300] sm:$0xff] }
  0x58   : > { %1121 = vmatpush.xpose.msk.msrb.mxu0 %vm302_vm0, %v253_v0  ;;  %1086 = vmatmul.msk.f32.vlgmr.msra.gmra.mxu1 %vm302_vm0, %v1299_v20  ;;  %v286_v0 = vld [vmem:[%s1372_s29 + $0x380] sm:$0xff] }
  0x59   : > { %1138 = vmatpush.xpose.msk.msrb.mxu1 %vm302_vm0, %v269_v1  ;;  %1103 = vmatmul.msk.f32.vlgmr.msra.gmra.mxu2 %vm302_vm0, %v1299_v20  ;;  %v921_v1 = vld [vmem:[%s1730_s1 + $0x78] sm:$0xff] }
  0x5a   : > { %1155 = vmatpush.xpose.msk.msrb.mxu2 %vm302_vm0, %v285_v2  ;;  %1120 = vmatmul.msk.f32.vlgmr.msra.gmra.mxu3 %vm302_vm0, %v1299_v20  ;;  %v920_v2 = vld [vmem:[%s1730_s1 + $0x70] sm:$0xff] }
  0x5b   : > { %1172 = vmatpush.xpose.msk.msrb.mxu3 %vm302_vm0, %v301_v3  ;;  %v919_v3 = vld [vmem:[%s1730_s1 + $0x68] sm:$0xff] }
  0x5c   : > { %1122 = vmatpush.xpose.msk.msrb.mxu0 %vm302_vm0, %v252_v4  ;;  %v918_v4 = vld [vmem:[%s1730_s1 + $0x60] sm:$0xff] }
  0x5d   : > { %1139 = vmatpush.xpose.msk.msrb.mxu1 %vm302_vm0, %v268_v5  ;;  %v917_v5 = vld [vmem:[%s1730_s1 + $0x58] sm:$0xff] }
  0x5e   : > { %1156 = vmatpush.xpose.msk.msrb.mxu2 %vm302_vm0, %v284_v6  ;;  %v916_v6 = vld [vmem:[%s1730_s1 + $0x50] sm:$0xff] }
  0x5f   : > { %1173 = vmatpush.xpose.msk.msrb.mxu3 %vm302_vm0, %v300_v7  ;;  %v915_v7 = vld [vmem:[%s1730_s1 + $0x48] sm:$0xff] }
  0x60   : > { %1123 = vmatpush.xpose.msk.msrb.mxu0 %vm302_vm0, %v251_v8  ;;  %v914_v8 = vld [vmem:[%s1730_s1 + $0x40] sm:$0xff] }
  0x61   : > { %1140 = vmatpush.xpose.msk.msrb.mxu1 %vm302_vm0, %v267_v9  ;;  %v913_v9 = vld [vmem:[%s1730_s1 + $0x38] sm:$0xff] }
  0x62   : > { %1157 = vmatpush.xpose.msk.msrb.mxu2 %vm302_vm0, %v283_v10  ;;  %v912_v10 = vld [vmem:[%s1730_s1 + $0x30] sm:$0xff] }
  0x63   : > { %1174 = vmatpush.xpose.msk.msrb.mxu3 %vm302_vm0, %v299_v11 }
  0x64   : > { %1124 = vmatpush.xpose.msk.msrb.mxu0 %vm302_vm0, %v250_v12 }
  0x65   : > { %1141 = vmatpush.xpose.msk.msrb.mxu1 %vm302_vm0, %v266_v13  ;;  %v911_v13 = vld [vmem:[%s1730_s1 + $0x28] sm:$0xff] }
  0x66   : > { %1158 = vmatpush.xpose.msk.msrb.mxu2 %vm302_vm0, %v282_v14  ;;  %v910_v14 = vld [vmem:[%s1730_s1 + $0x20] sm:$0xff] }
  0x67   : > { %1175 = vmatpush.xpose.msk.msrb.mxu3 %vm302_vm0, %v298_v15 }
  0x68   : > { %1125 = vmatpush.xpose.msk.msrb.mxu0 %vm302_vm0, %v249_v16 }
  0x69   : > { %1142 = vmatpush.xpose.msk.msrb.mxu1 %vm302_vm0, %v265_v17 }
  0x6a   : > { %1159 = vmatpush.xpose.msk.msrb.mxu2 %vm302_vm0, %v281_v18  ;;  %v909_v18 = vld [vmem:[%s1730_s1 + $0x18] sm:$0xff] }
  0x6b   : > { %1176 = vmatpush.xpose.msk.msrb.mxu3 %vm302_vm0, %v297_v19 }
  0x6c   : > { %1126 = vmatpush.xpose.msk.msrb.mxu0 %vm302_vm0, %v248_v21  ;;  %v908_v21 = vld [vmem:[%s1730_s1 + $0x10] sm:$0xff] }
  0x6d   : > { %1143 = vmatpush.xpose.msk.msrb.mxu1 %vm302_vm0, %v264_v22 }
  0x6e   : > { %1160 = vmatpush.xpose.msk.msrb.mxu2 %vm302_vm0, %v280_v23 }
  0x6f   : > { %1177 = vmatpush.xpose.msk.msrb.mxu3 %vm302_vm0, %v296_v24  ;;  %v907_v24 = vld [vmem:[%s1730_s1 + $0x8] sm:$0xff] }
  0x70   : > { %1127 = vmatpush.xpose.msk.msrb.mxu0 %vm302_vm0, %v247_v25  ;;  %v906_v25 = vld [vmem:[%s1730_s1] sm:$0xff] }
  0x71   : > { %1144 = vmatpush.xpose.msk.msrb.mxu1 %vm302_vm0, %v263_v26 }
  0x72   : > { %1161 = vmatpush.xpose.msk.msrb.mxu2 %vm302_vm0, %v279_v27 }
  0x73   : > { %1178 = vmatpush.xpose.msk.msrb.mxu3 %vm302_vm0, %v295_v28 }
  0x74   : > { %1128 = vmatpush.xpose.msk.msrb.mxu0 %vm302_vm0, %v246_v29 }
  0x75   : > { %1145 = vmatpush.xpose.msk.msrb.mxu1 %vm302_vm0, %v262_v30 }
  0x76   : > { %1162 = vmatpush.xpose.msk.msrb.mxu2 %vm302_vm0, %v278_v31 }
  0x77   : > { %1179 = vmatpush.xpose.msk.msrb.mxu3 %vm302_vm0, %v294_v32 }
  0x78   : > { %1129 = vmatpush.xpose.msk.msrb.mxu0 %vm302_vm0, %v245_v33 }
  0x79   : > { %1146 = vmatpush.xpose.msk.msrb.mxu1 %vm302_vm0, %v261_v34 }
  0x7a   : > { %1163 = vmatpush.xpose.msk.msrb.mxu2 %vm302_vm0, %v277_v35 }
  0x7b   : > { %1180 = vmatpush.xpose.msk.msrb.mxu3 %vm302_vm0, %v293_v36 }
  0x7c   : > { %1130 = vmatpush.xpose.msk.msrb.mxu0 %vm302_vm0, %v244_v37 }
  0x7d   : > { %1147 = vmatpush.xpose.msk.msrb.mxu1 %vm302_vm0, %v260_v38 }
  0x7e   : > { %1164 = vmatpush.xpose.msk.msrb.mxu2 %vm302_vm0, %v276_v39 }
  0x7f   : > { %1181 = vmatpush.xpose.msk.msrb.mxu3 %vm302_vm0, %v292_v40 }
  0x80   : > { %1131 = vmatpush.xpose.msk.msrb.mxu0 %vm302_vm0, %v243_v41 }
  0x81   : > { %1148 = vmatpush.xpose.msk.msrb.mxu1 %vm302_vm0, %v259_v42 }
  0x82   : > { %1165 = vmatpush.xpose.msk.msrb.mxu2 %vm302_vm0, %v275_v43 }
  0x83   : > { %1182 = vmatpush.xpose.msk.msrb.mxu3 %vm302_vm0, %v291_v44 }
  0x84   : > { %1132 = vmatpush.xpose.msk.msrb.mxu0 %vm302_vm0, %v242_v45 }
  0x85   : > { %1149 = vmatpush.xpose.msk.msrb.mxu1 %vm302_vm0, %v258_v46 }
  0x86   : > { %1166 = vmatpush.xpose.msk.msrb.mxu2 %vm302_vm0, %v274_v47 }
  0x87   : > { %1183 = vmatpush.xpose.msk.msrb.mxu3 %vm302_vm0, %v290_v48 }
  0x88   : > { %1133 = vmatpush.xpose.msk.msrb.mxu0 %vm302_vm0, %v241_v49 }
  0x89   : > { %1150 = vmatpush.xpose.msk.msrb.mxu1 %vm302_vm0, %v257_v50 }
  0x8a   : > { %1167 = vmatpush.xpose.msk.msrb.mxu2 %vm302_vm0, %v273_v51 }
  0x8b   : > { %1184 = vmatpush.xpose.msk.msrb.mxu3 %vm302_vm0, %v289_v52 }
  0x8c   : > { %1134 = vmatpush.xpose.msk.msrb.mxu0 %vm302_vm0, %v240_v53 }
  0x8d   : > { %1151 = vmatpush.xpose.msk.msrb.mxu1 %vm302_vm0, %v256_v54 }
  0x8e   : > { %1168 = vmatpush.xpose.msk.msrb.mxu2 %vm302_vm0, %v272_v55 }
  0x8f   : > { %1185 = vmatpush.xpose.msk.msrb.mxu3 %vm302_vm0, %v288_v56 }
  0x90   : > { %1135 = vmatpush.xpose.msk.msrb.mxu0 %vm302_vm0, %v239_v57 }
  0x91   : > { %1152 = vmatpush.xpose.msk.msrb.mxu1 %vm302_vm0, %v255_v58 }
  0x92   : > { %1169 = vmatpush.xpose.msk.msrb.mxu2 %vm302_vm0, %v271_v59 }
  0x93   : > { %1186 = vmatpush.xpose.msk.msrb.mxu3 %vm302_vm0, %v287_v60 }
  0x94   : > { %1136 = vmatpush.xpose.msk.msrb.mxu0 %vm302_vm0, %v238_v61 }
  0x95   : > { %1153 = vmatpush.xpose.msk.msrb.mxu1 %vm302_vm0, %v254_v62 }
  0x96   : > { %1170 = vmatpush.xpose.msk.msrb.mxu2 %vm302_vm0, %v270_v63 }
  0x97   : > { %1187 = vmatpush.xpose.msk.msrb.mxu3 %vm302_vm0, %v286_v0  ;;  %1137 = vmatmul.msk.f32.vlgmr.msrb.gmra.mxu0 %vm302_vm0, %v1299_v20 }
  0x98   : > { %1154 = vmatmul.msk.f32.vlgmr.msrb.gmra.mxu1 %vm302_vm0, %v1299_v20  ;;  %949 = vmatpush.msra.mxu0 %v921_v1 }
  0x99   : > { %1171 = vmatmul.msk.f32.vlgmr.msrb.gmra.mxu2 %vm302_vm0, %v1299_v20 }
  0x9a   : > { %1188 = vmatmul.msk.f32.vlgmr.msrb.gmra.mxu3 %vm302_vm0, %v1299_v20  ;;  %950 = vmatpush.msra.mxu0 %v920_v2 }
  0x9c   : > { %951 = vmatpush.msra.mxu0 %v919_v3 }
  0x9e   : > { %952 = vmatpush.msra.mxu0 %v918_v4 }
  0xa0   : > { %953 = vmatpush.msra.mxu0 %v917_v5 }
  0xa2   : > { %954 = vmatpush.msra.mxu0 %v916_v6 }
  0xa4   : > { %955 = vmatpush.msra.mxu0 %v915_v7 }
  0xa6   : > { %956 = vmatpush.msra.mxu0 %v914_v8 }
  0xa8   : > { %957 = vmatpush.msra.mxu0 %v913_v9 }
  0xaa   : > { %958 = vmatpush.msra.mxu0 %v912_v10 }
  0xac   : > { %959 = vmatpush.msra.mxu0 %v911_v13 }
  0xae   : > { %960 = vmatpush.msra.mxu0 %v910_v14 }
  0xb0   : > { %961 = vmatpush.msra.mxu0 %v909_v18 }
  0xb2   : > { %962 = vmatpush.msra.mxu0 %v908_v21 }
  0xb4   : > { %963 = vmatpush.msra.mxu0 %v907_v24  ;;  %v1234_v24 = vld [vmem:[%s1731_s2] ss:$0 sm:$0xff] }
  0xb6   : > { %964 = vmatpush.msra.mxu0 %v906_v25 }
  0xd4   : > { %v371_v11 = vpop.f32.mrf.mxu0 }
  0xd5   : > { %v439_v12 = vpop.f32.mrf.mxu1  ;;  %v850_v15 = vrot.slane %v371_v11, 4 }
  0xd6   : > { %v856_v16 = vrot.slane %v439_v12, 4 }
  0xd7   : > { %v851_v22 = vadd.f32 %v850_v15, %v371_v11 }
  0xd8   : > { %v857_v23 = vadd.f32 %v856_v16, %v439_v12 }
  0xd9   : > { %v852_v28 = vrot.slane %v851_v22, 2 }
  0xda   : > { %v858_v29 = vrot.slane %v857_v23, 2 }
  0xdb   : > { %v853_v32 = vadd.f32 %v852_v28, %v851_v22 }
  0xdc   : > { %v507_v17 = vpop.f32.mrf.mxu2  ;;  %v859_v33 = vadd.f32 %v858_v29, %v857_v23 }
  0xdd   : > { %v862_v19 = vrot.slane %v507_v17, 4  ;;  %v575_v20 = vpop.f32.mrf.mxu3  ;;  %v854_v36 = vrot.slane %v853_v32, 1 }
  0xde   : > { %v868_v26 = vrot.slane %v575_v20, 4  ;;  %v860_v37 = vrot.slane %v859_v33, 1 }
  0xdf   : > { %v863_v27 = vadd.f32 %v862_v19, %v507_v17  ;;  %v855_v44 = vadd.f32 %v854_v36, %v853_v32 }
  0xe0   : > { %v869_v30 = vadd.f32 %v868_v26, %v575_v20  ;;  %v861_v45 = vadd.f32 %v860_v37, %v859_v33 }
  0xe1   : > { %v864_v31 = vrot.slane %v863_v27, 2  ;;  %v898_v52 = vmul.f32 0.001953125, %v855_v44 }
  0xe2   : > { %v870_v34 = vrot.slane %v869_v30, 2  ;;  %v899_v53 = vmul.f32 0.001953125, %v861_v45 }
  0xe3   : > { %v865_v35 = vadd.f32 %v864_v31, %v863_v27 }
  0xe4   : > { %v871_v40 = vadd.f32 %v870_v34, %v869_v30  ;;  %v935_v2 = vsel %vm934_vm1, %v899_v53, %v898_v52 }
  0xe5   : > { %v866_v43 = vrot.slane %v865_v35, 1 }
  0xe6   : > { %v872_v48 = vrot.slane %v871_v40, 1 }
  0xe7   : > { %v867_v51 = vadd.f32 %v866_v43, %v865_v35 }
  0xe8   : > { %v873_v60 = vadd.f32 %v872_v48, %v871_v40 }
  0xe9   : > { %v900_v63 = vmul.f32 0.001953125, %v867_v51 }
  0xea   : > { %v901_v6 = vmul.f32 0.001953125, %v873_v60 }
  0xeb   : > { %v937_v8 = vsel %vm936_vm2, %v900_v63, %v935_v2 }
  0xec   : > { %v939_v14 = vsel %vm938_vm3, %v901_v6, %v937_v8 }
 0x114   : > { %v643_v38 = vpop.f32.mrf.mxu0 }
 0x115   : > { %v711_v39 = vpop.f32.mrf.mxu1  ;;  %v874_v41 = vrot.slane %v643_v38, 4 }
 0x116   : > { %v880_v42 = vrot.slane %v711_v39, 4 }
 0x117   : > { %v875_v46 = vadd.f32 %v874_v41, %v643_v38 }
 0x118   : > { %v881_v47 = vadd.f32 %v880_v42, %v711_v39 }
 0x119   : > { %v876_v49 = vrot.slane %v875_v46, 2 }
 0x11a   : > { %v882_v50 = vrot.slane %v881_v47, 2 }
 0x11b   : > { %v877_v54 = vadd.f32 %v876_v49, %v875_v46 }
 0x11c   : > { %v883_v55 = vadd.f32 %v882_v50, %v881_v47  ;;  %v779_v56 = vpop.f32.mrf.mxu2 }
 0x11d   : > { %v847_v57 = vpop.f32.mrf.mxu3  ;;  %v886_v58 = vrot.slane %v779_v56, 4  ;;  %v878_v61 = vrot.slane %v877_v54, 1 }
 0x11e   : > { %v892_v59 = vrot.slane %v847_v57, 4  ;;  %v884_v62 = vrot.slane %v883_v55, 1 }
 0x11f   : > { %v887_v0 = vadd.f32 %v886_v58, %v779_v56  ;;  %v879_v3 = vadd.f32 %v878_v61, %v877_v54 }
 0x120   : > { %v893_v1 = vadd.f32 %v892_v59, %v847_v57  ;;  %v885_v7 = vadd.f32 %v884_v62, %v883_v55 }
 0x121   : > { %v888_v4 = vrot.slane %v887_v0, 2  ;;  %v902_v9 = vmul.f32 0.001953125, %v879_v3 }
 0x122   : > { %v894_v5 = vrot.slane %v893_v1, 2  ;;  %v903_v15 = vmul.f32 0.001953125, %v885_v7 }
 0x123   : > { %v889_v10 = vadd.f32 %v888_v4, %v887_v0  ;;  %v941_v18 = vsel %vm940_vm4, %v902_v9, %v939_v14 }
 0x124   : > { %v895_v11 = vadd.f32 %v894_v5, %v893_v1  ;;  %v943_v21 = vsel %vm942_vm5, %v903_v15, %v941_v18 }
 0x125   : > { %v890_v12 = vrot.slane %v889_v10, 1 }
 0x126   : > { %v896_v13 = vrot.slane %v895_v11, 1 }
 0x127   : > { %v891_v16 = vadd.f32 %v890_v12, %v889_v10 }
 0x128   : > { %v897_v17 = vadd.f32 %v896_v13, %v895_v11 }
 0x129   : > { %v904_v19 = vmul.f32 0.001953125, %v891_v16 }
 0x12a   : > { %v905_v20 = vmul.f32 0.001953125, %v897_v17 }
 0x12b   : > { %v945_v22 = vsel %vm944_vm6, %v904_v19, %v943_v21 }
 0x12c   : > { %v947_v23 = vsel %vm946_vm7, %v905_v20, %v945_v22 }
 0x12d   : > { %965 = vmatmul.f32.vlgmr.msra.gmra.mxu0 %v947_v23 }
 0x1aa   : > { %v966_v25 = vpop.f32.mrf.mxu0 }
 0x1ab   : > { %v967_v26 = vadd.f32 %v1234_v24, %v966_v25 }
 0x1ad   : > { %969 = vst [vmem:[%s166_s6] sm:$0xff] %v967_v26 }
 0x1ae   : > { %1262 = shalt.err (!%p1259_p3)
}
 0x1af   : > { %1194 = dma.vmem_to_hbm [thread:$0]  (%p1355_p5), %s984_s7, 128, %s986_s8, %s971_s9  }
 0x1b0 PF: > { %p1200_p4 = scmp.ge.s32.totalorder %s1297_s15, 2  ;;  %s997_s25 = sand.u32 1, %s1285_s12  }
 0x1b1   : > { %s998_s26 = scalar_lea.sflag [#allocation3], %s997_s25 }
 0x1b2   : > { %p1197_p7 = pnand %p1200_p4, %p1359_p6 }
 0x1b4   : > { %p1198_p8 = pneg %p1197_p7 }
 0x1b6   : > { %1280 = dma.done.wait (%p1198_p8), %s998_s26, 128  }
 0x1b7   : > { %1282 = vsyncadd (%p1198_p8), %s998_s26, 4294967168  ;;  %p13_p9 = scmp.ge.s32.totalorder %s1343_s18, 4   ;;  %s1735_s12 = smov %s1289_s13 }
 0x1b8   : > { %s1736_s13 = smov %s1293_s14  ;;  %s1737_s14 = smov %s1353_s21 }
 0x1b9   : > { %s1738_s15 = smov %s1343_s18  ;;  %15 = sbr.rel (!%p13_p9) target bundleno = 3 (0x3), region = 67 }
 0x1be   :  { %1004 = vsyncpa [#allocation3], 1 }
 0x1bf   :  { %1006 = vsyncpa [#allocation3 + $0x1], 1 }

</bundles_post_ra>
